<compile_context>
chip_gen: v6e
topology: v6e:2x2x1
jax: 0.10.0
libtpu: 0.0.40
codegen_flags: <defaults>
</compile_context>

<pallas_src>
import jax
import jax.numpy as jnp
from jax.experimental import pallas as pl
from jax.experimental.pallas import tpu as pltpu


def _round_up(x, m):
    return ((x + m - 1) // m) * m


def _patch_embed_kernel(p_ref, w_ref, b_ref, o_ref):
    # p_ref: (TM, K_pad)     streamed tile of flattened patches (compute dtype)
    # w_ref: (K_pad, E_pad)  projection weight, VMEM-resident, single-buffered
    # b_ref: (1, E_pad)      bias (f32), VMEM-resident, single-buffered
    # o_ref: (TM, E_pad)     output tile
    acc = jnp.dot(p_ref[...], w_ref[...], preferred_element_type=jnp.float32)
    o_ref[...] = (acc + b_ref[...]).astype(o_ref.dtype)


def _resident_spec(shape):
    """BlockSpec for a grid-invariant operand (single-buffered if supported)."""
    kwargs = {}
    if hasattr(pl, "Buffered"):
        # Constant index_map -> DMA'd once; no need for a second VMEM buffer.
        kwargs["pipeline_mode"] = pl.Buffered(1)
    return pl.BlockSpec(shape, lambda i: (0,) * len(shape), **kwargs)


def patch_embed(x, weight, bias, patch_size, *, flatten=True, tile_m=1024,
                compute_dtype=jnp.bfloat16, allow_input_fusion=True):
    """JAX/Pallas equivalent of PatchEmbed.forward (norm = Identity)."""
    B, C, H, W = x.shape
    ph, pw = patch_size
    gh, gw = H // ph, W // pw
    E = weight.shape[0]
    num_patches = gh * gw
    K = C * ph * pw
    M = B * num_patches
    out_dtype = x.dtype

    # Patchify: (B, C, H, W) -> (M, K).  The (C, ph, pw) flattening order
    # matches the torch Conv2d weight layout (O, I, kh, kw).  With
    # allow_input_fusion, XLA may fuse this reshape/transpose (and the casts /
    # pads below) into the kernel's input DMA instead of materializing the
    # patched activation in HBM.
    patches = (
        x.reshape(B, C, gh, ph, gw, pw)
        .transpose(0, 2, 4, 1, 3, 5)
        .reshape(M, K)
        .astype(compute_dtype)
    )
    w_t = weight.reshape(E, K).T.astype(compute_dtype)  # (K, E)
    bias_f32 = bias.astype(jnp.float32)

    # Lane/MXU-friendly padding of the contraction (K) and embedding (E) dims.
    K_pad = max(_round_up(K, 128), 128)
    E_pad = max(_round_up(E, 128), 128)
    if K_pad != K:
        patches = jnp.pad(patches, ((0, 0), (0, K_pad - K)))
        w_t = jnp.pad(w_t, ((0, K_pad - K), (0, 0)))
    if E_pad != E:
        w_t = jnp.pad(w_t, ((0, 0), (0, E_pad - E)))
        bias_f32 = jnp.pad(bias_f32, (0, E_pad - E))
    b2 = bias_f32.reshape(1, E_pad)

    # Tile the M axis: largest TM within a cross-generation VMEM budget.
    cd_size = jnp.dtype(compute_dtype).itemsize
    out_size = jnp.dtype(out_dtype).itemsize
    TM = _round_up(min(tile_m, _round_up(M, 8)), 8)
    budget = 40 << 20  # leaves headroom even on v7x's 64 MiB per-TC VMEM
    while TM > 8 and 2 * TM * (K_pad * cd_size + E_pad * out_size) > budget:
        TM //= 2
    TM = max(_round_up(TM, 8), 8)

    M_pad = _round_up(M, TM)
    grid_m = M_pad // TM
    # Even tile count so v7x's two TensorCores split the parallel M axis evenly.
    if grid_m > 1 and grid_m % 2 == 1:
        grid_m += 1
        M_pad += TM
    if M_pad != M:
        patches = jnp.pad(patches, ((0, M_pad - M), (0, 0)))

    # VMEM plan: 2x streamed (TM,K_pad) in, 2x (TM,E_pad) out, 1x resident W+b.
    vmem_need = (2 * TM * K_pad * cd_size
                 + 2 * TM * E_pad * out_size
                 + K_pad * E_pad * cd_size
                 + E_pad * 4)
    vmem_limit = int(min(max(2 * vmem_need, 32 << 20), 56 << 20))

    cost = pl.CostEstimate(
        flops=2 * M_pad * K_pad * E_pad,
        transcendentals=0,
        bytes_accessed=(M_pad * K_pad * cd_size
                        + K_pad * E_pad * cd_size
                        + E_pad * 4
                        + M_pad * E_pad * out_size),
    )

    compiler_params = pltpu.CompilerParams(
        # Independent M tiles -> megacore-parallel on v7x (2 TCs/chip).
        dimension_semantics=("parallel",),
        vmem_limit_bytes=vmem_limit,
        # Fuse the patchify reshape/transpose/cast into the input DMAs.
        allow_input_fusion=[True, True, True] if allow_input_fusion else None,
    )

    # TODO(synk): for very large K_pad*E_pad weights (video / large-patch /
    # many-channel variants), add a trailing "arbitrary" K grid axis with an
    # f32 VMEM accumulator instead of keeping the whole weight VMEM-resident.
    out = pl.pallas_call(
        _patch_embed_kernel,
        out_shape=jax.ShapeDtypeStruct((M_pad, E_pad), out_dtype),
        grid=(grid_m,),
        in_specs=[
            pl.BlockSpec((TM, K_pad), lambda i: (i, 0)),  # streamed patch tiles
            _resident_spec((K_pad, E_pad)),               # weight: VMEM-resident
            _resident_spec((1, E_pad)),                   # bias:   VMEM-resident
        ],
        out_specs=pl.BlockSpec((TM, E_pad), lambda i: (i, 0)),
        compiler_params=compiler_params,
        cost_estimate=cost,
    )(patches, w_t, b2)

    out = out[:M, :E].reshape(B, num_patches, E)
    if not flatten:
        # Undo the flatten: (B, E, gh, gw), matching Conv2d output layout.
        out = out.transpose(0, 2, 1).reshape(B, E, gh, gw)
    return out


if __name__ == "__main__":
    # Small shapes consistent with the module: img=16, patch=8, in_chans=4, embed_dim=32.
    B, C, H, W = 2, 4, 16, 16
    ph = pw = 8
    E = 32

    key = jax.random.PRNGKey(0)
    k_x, k_w, k_b = jax.random.split(key, 3)
    x = jax.random.normal(k_x, (B, C, H, W), dtype=jnp.float32)
    # Deterministic synthetic parameters (Conv2d: weight (E, C, ph, pw), bias (E,)).
    weight = 0.02 * jax.random.normal(k_w, (E, C, ph, pw), dtype=jnp.float32)
    bias = 0.02 * jax.random.normal(k_b, (E,), dtype=jnp.float32)

    # Pure-JAX reference: strided conv (full precision) then flatten(2).transpose(1,2).
    ref = jax.lax.conv_general_dilated(
        x, weight, window_strides=(ph, pw), padding="VALID",
        dimension_numbers=("NCHW", "OIHW", "NCHW"),
        precision=jax.lax.Precision.HIGHEST,
    ) + bias[None, :, None, None]
    ref = ref.reshape(B, E, -1).transpose(0, 2, 1)

    # Default (bf16 MXU) path.
    out_bf16 = jax.block_until_ready(patch_embed(x, weight, bias, (ph, pw)))
    assert out_bf16.shape == (B, (H // ph) * (W // pw), E), out_bf16.shape
    assert jnp.allclose(out_bf16, ref, atol=2e-2, rtol=2e-2), float(
        jnp.max(jnp.abs(out_bf16 - ref)))

    # f32 path (tighter check of indexing / patch ordering).
    out_f32 = jax.block_until_ready(
        patch_embed(x, weight, bias, (ph, pw), compute_dtype=jnp.float32))
    assert jnp.allclose(out_f32, ref, atol=5e-3, rtol=5e-3), float(
        jnp.max(jnp.abs(out_f32 - ref)))

    print("KERNEL_OK")
</pallas_src>

<mosaic_0001>
module attributes {stable_mosaic.version = 11 : i64} {
  func.func @_patch_embed_kernel(%arg0: i32, %arg1: memref<8x256xbf16, #tpu.memory_space<vmem>>, %arg2: memref<256x128xbf16, #tpu.memory_space<vmem>>, %arg3: memref<1x128xf32, #tpu.memory_space<vmem>>, %arg4: memref<8x128xf32, #tpu.memory_space<vmem>>) attributes {dimension_semantics = [#tpu.dimension_semantics<parallel>], iteration_bounds = array<i64: 1>, scalar_prefetch = 0 : i64, scratch_operands = 0 : i64, tpu.core_type = #tpu.core_type<tc>, window_params = [{transform_indices = @transform_0, window_bounds = array<i64: 8, 256>}, {pipeline_mode = #tpu.pipeline_mode<synchronous>, transform_indices = @transform_1, window_bounds = array<i64: 256, 128>}, {pipeline_mode = #tpu.pipeline_mode<synchronous>, transform_indices = @transform_2, window_bounds = array<i64: 1, 128>}, {transform_indices = @transform_3, window_bounds = array<i64: 8, 128>}]} {
    %c0 = arith.constant 0 : index
    %c0_0 = arith.constant 0 : index
    %0 = vector.load %arg1[%c0, %c0_0] : memref<8x256xbf16, #tpu.memory_space<vmem>>, vector<8x256xbf16>
    %c0_1 = arith.constant 0 : index
    %c0_2 = arith.constant 0 : index
    %1 = vector.load %arg2[%c0_1, %c0_2] : memref<256x128xbf16, #tpu.memory_space<vmem>>, vector<256x128xbf16>
    %cst = arith.constant dense<0.000000e+00> : vector<8x128xf32>
    %2 = tpu.matmul %0, %1, %cst {dimension_numbers = #tpu.dot_dimension_numbers<[1], [0], [0], [1], [0, 0, 1, 1], [], []>} : vector<8x256xbf16>, vector<256x128xbf16>, vector<8x128xf32> -> vector<8x128xf32>
    %c0_3 = arith.constant 0 : index
    %c0_4 = arith.constant 0 : index
    %3 = vector.load %arg3[%c0_3, %c0_4] : memref<1x128xf32, #tpu.memory_space<vmem>>, vector<1x128xf32>
    %4 = vector.broadcast %3 : vector<1x128xf32> to vector<8x128xf32>
    %5 = arith.addf %2, %4 : vector<8x128xf32>
    %c0_5 = arith.constant 0 : index
    %c0_6 = arith.constant 0 : index
    %6 = vector.load %arg4[%c0_5, %c0_6] : memref<8x128xf32, #tpu.memory_space<vmem>>, vector<8x128xf32>
    tpu.vector_store %arg4[%c0_5, %c0_6], %5 {strides = array<i32>} : memref<8x128xf32, #tpu.memory_space<vmem>>, vector<8x128xf32>,
    return
  }
  func.func @transform_0(%arg0: i32) -> (i32, i32) {
    %c0_i32 = arith.constant 0 : i32
    %c0_i32_0 = arith.constant 0 : i32
    return %arg0, %c0_i32 : i32, i32
  }
  func.func @transform_1(%arg0: i32) -> (i32, i32) {
    %c0_i32 = arith.constant 0 : i32
    %c0_i32_0 = arith.constant 0 : i32
    %c0_i32_1 = arith.constant 0 : i32
    return %c0_i32, %c0_i32_0 : i32, i32
  }
  func.func @transform_2(%arg0: i32) -> (i32, i32) {
    %c0_i32 = arith.constant 0 : i32
    %c0_i32_0 = arith.constant 0 : i32
    %c0_i32_1 = arith.constant 0 : i32
    return %c0_i32, %c0_i32_0 : i32, i32
  }
  func.func @transform_3(%arg0: i32) -> (i32, i32) {
    %c0_i32 = arith.constant 0 : i32
    %c0_i32_0 = arith.constant 0 : i32
    return %arg0, %c0_i32 : i32, i32
  }
}

</mosaic_0001>

<bundles_post_ra>
// kernel: tpu_custom_call.1
= control target key start
LH: loop header
LB: loop body
LE: loop exit
PB: predicated region body
PF: predicated region fallthrough
CT: control target
= control target key end

     0   :  { %8 = vsyncpa [#allocation3], 0  ;;  %s409_s0 = inlined_call_operand.hbm [shape: bf16[8,256], index: 0, kind: input, shape index: {}]   ;;  %s410_s1 = inlined_call_operand.hbm [shape: bf16[256,128], index: 1, kind: input, shape index: {}]   ;;  %s411_s2 = inlined_call_operand.vmem [shape: f32[1,128], index: 2, kind: input, shape index: {}]   ;;  %s412_s3 = inlined_call_operand.hbm [shape: f32[8,128], index: 3, kind: output, shape index: {}]  }
   0x1   :  { %9 = vsyncpa [#allocation6], 0 }
   0x2   :  { %10 = vsyncpa [#allocation4], 0  ;;  %s372_s12 = smov [#allocation2]   ;;  %s373_s14 = smov [#allocation5]  }
   0x3   :  { %s17_s13 = sshll.u32 %s372_s12, 4  ;;  %s26_s15 = sshll.u32 %s373_s14, 4  ;;  %s18_s13 = int_to_ptr.vmem [resolvable:$true] %s17_s13  ;;  %s27_s15 = int_to_ptr.vmem [resolvable:$true] %s26_s15 }
   0x4   :  { %s314_s16 = scalar_lea.vmem %s18_s13, 128  ;;  %p319_p1 = scmp.lt.s32.totalorder %s18_s13, %s18_s13 }
   0x5   :  { %p315_p0 = scmp.ne.s32.totalorder %s18_s13, %s314_s16  ;;  %p320_p2 = scmp.lt.s32.totalorder %s314_s16, %s314_s16 }
   0x7   :  { %p321_p3 = por %p320_p2, %p319_p1 }
   0x9   :  { %p322_p4 = pnand %p321_p3, %p315_p0 }
   0xb   :  { %325 = shalt.err (!%p322_p4)
}
   0xc   :  { %20 = dma.hbm_to_vmem [thread:$0]  %s409_s0, 128, %s18_s13, [#allocation3]  }
   0xd   :  { %s334_s19 = scalar_lea.vmem %s27_s15, 2048  ;;  %p339_p6 = scmp.lt.s32.totalorder %s27_s15, %s27_s15 }
   0xe   :  { %p335_p5 = scmp.ne.s32.totalorder %s27_s15, %s334_s19  ;;  %p340_p7 = scmp.lt.s32.totalorder %s334_s19, %s334_s19 }
  0x10   :  { %p341_p8 = por %p340_p7, %p339_p6 }
  0x12   :  { %p342_p9 = pnand %p341_p8, %p335_p5 }
  0x14   :  { %345 = shalt.err (!%p342_p9)
}
  0x15   :  { %s374_s20 = smov 64   ;;  %s375_s21 = smov 4  }
  0x16   :  { %32 = dma.hbm_to_vmem [thread:$0]  %s410_s1, 2048, %s27_s15, [#allocation6], %s374_s20, %s374_s20, %s375_s21  }
  0x17   :  { %366 = dma.done.wait [#allocation3], 128  }
  0x18   :  { %367 = vsyncadd [#allocation3], 4294967168 }
  0x19   :  { %368 = dma.done.wait [#allocation6], 2048  }
  0x1a   :  { %369 = vsyncadd [#allocation6], 4294965248  ;;  %v288_v0 = vld [vmem:[#allocation5 + $0x78] sm:$0xff]   ;;  %v290_v2 = vld [vmem:[#allocation5 + $0x70] sm:$0xff]   ;;  %s376_s24 = smov [#allocation7]  }
  0x1b   :  { %v289_v1 = vld [vmem:[#allocation5 + $0x38] sm:$0xff]   ;;  %261 = vmatprep.subr.bf16.mxu0 %v288_v0  ;;  %v291_v3 = vld [vmem:[#allocation5 + $0x30] sm:$0xff]   ;;  %v292_v4 = vld [vmem:[#allocation5 + $0x68] sm:$0xff]   ;;  %s232_s25 = sshll.u32 %s376_s24, 4  ;;  %s233_s25 = int_to_ptr.vmem [resolvable:$true] %s232_s25 }
  0x1c   :  { %262 = vmatpush3.bf16.msra.mxu0 %v289_v1  ;;  %v293_v5 = vld [vmem:[#allocation5 + $0x28] sm:$0xff]   ;;  %v294_v6 = vld [vmem:[#allocation5 + $0x60] sm:$0xff]   ;;  %v296_v8 = vld [vmem:[#allocation5 + $0x58] sm:$0xff]   ;;  %s346_s26 = scalar_lea.vmem %s233_s25, 128  ;;  %p351_p11 = scmp.lt.s32.totalorder %s233_s25, %s233_s25 }
  0x1d   :  { %263 = vmatprep.subr.bf16.mxu0 %v290_v2  ;;  %v295_v7 = vld [vmem:[#allocation5 + $0x20] sm:$0xff]   ;;  %v297_v9 = vld [vmem:[#allocation5 + $0x18] sm:$0xff]   ;;  %v298_v10 = vld [vmem:[#allocation5 + $0x50] sm:$0xff]   ;;  %p347_p10 = scmp.ne.s32.totalorder %s233_s25, %s346_s26  ;;  %p352_p12 = scmp.lt.s32.totalorder %s346_s26, %s346_s26 }
  0x1e   :  { %v42_v11 = vld [vmem:[#allocation2] sm:$0xff]  ;;  %v299_v13 = vld [vmem:[#allocation5 + $0x10] sm:$0xff]   ;;  %v300_v14 = vld [vmem:[#allocation5 + $0x48] sm:$0xff]  }
  0x1f   :  { %v244_v12 = vcombine.high %v42_v11, %v42_v11  ;;  %v301_v15 = vld [vmem:[#allocation5 + $0x8] sm:$0xff]   ;;  %v302_v16 = vld [vmem:[#allocation5 + $0x40] sm:$0xff]   ;;  %v243_v18 = vcombine.low %v42_v11, %v42_v11  ;;  %v242_v20 = vld [vmem:[%s411_s2] ss:$0 sm:$0xff]  ;;  %p353_p13 = por %p352_p12, %p351_p11 }
  0x20   :  { %264 = vmatpush3.bf16.msra.mxu0 %v291_v3  ;;  %v303_v17 = vld [vmem:[#allocation5] sm:$0xff]  }
  0x21   :  { %265 = vmatprep.subr.bf16.mxu0 %v292_v4  ;;  %217 = vmatprep.mubr.bf16.mxu0 %v244_v12  ;;  %p354_p0 = pnand %p353_p13, %p347_p10 }
  0x24   :  { %266 = vmatpush3.bf16.msra.mxu0 %v293_v5 }
  0x25   :  { %267 = vmatprep.subr.bf16.mxu0 %v294_v6 }
  0x28   :  { %268 = vmatpush3.bf16.msra.mxu0 %v295_v7 }
  0x29   :  { %269 = vmatprep.subr.bf16.mxu0 %v296_v8 }
  0x2c   :  { %270 = vmatpush3.bf16.msra.mxu0 %v297_v9 }
  0x2d   :  { %271 = vmatprep.subr.bf16.mxu0 %v298_v10 }
  0x30   :  { %272 = vmatpush3.bf16.msra.mxu0 %v299_v13 }
  0x31   :  { %273 = vmatprep.subr.bf16.mxu0 %v300_v14 }
  0x34   :  { %274 = vmatpush3.bf16.msra.mxu0 %v301_v15 }
  0x35   :  { %275 = vmatprep.subr.bf16.mxu0 %v302_v16 }
  0x38   :  { %276 = vmatpush3.bf16.msra.mxu0 %v303_v17 }
  0x3b   :  { %218 = vmatmul.mubr.bf16.vlgmr.msra.gmra.mxu0 %v243_v18 }
  0xfb   :  { %v277_v19 = vpop.f32.mrf.mxu0 }
  0xfd   :  { %v278_v21 = vpop.f32.mrf.mxu0 }
  0xfe   :  { %v279_v22 = vadd.f32 %v278_v21, %v277_v19 }
  0xff   :  { %v280_v23 = vpop.f32.mrf.mxu0 }
 0x100   :  { %v220_v24 = vadd.f32 %v279_v22, %v242_v20 }
 0x101   :  { %v281_v25 = vpop.f32.mrf.mxu0 }
 0x102   :  { %225 = vst [vmem:[#allocation7] sm:$0xff] %v220_v24 }
 0x103   :  { %357 = shalt.err (!%p354_p0)
}
 0x104   :  { %235 = dma.vmem_to_hbm [thread:$0]  %s233_s25, 128, %s412_s3, [#allocation4]  }
 0x105   :  { %370 = dma.done.wait [#allocation4], 128  }
 0x106   :  { %371 = vsyncadd [#allocation4], 4294967168 }
 0x107   :  { %239 = vsyncpa [#allocation3], 1 }
 0x108   :  { %240 = vsyncpa [#allocation6], 1 }
 0x109   :  { %241 = vsyncpa [#allocation4], 1 }

</bundles_post_ra>
